<compile_context>
chip_gen: v7x
topology: tpu7x:2x2x1
jax: 0.10.0
libtpu: 0.0.40
codegen_flags: <defaults>
</compile_context>

<pallas_src>
import numpy as np
import jax
import jax.numpy as jnp
from jax.experimental import pallas as pl
from jax.experimental.pallas import tpu as pltpu


def _round_up(x, m):
    return (x + m - 1) // m * m


_VMEM_BUDGET = 12 * 1024 * 1024   # per-call tile budget: fits the smallest default scoped VMEM
_VMEM_LIMIT = 32 * 1024 * 1024    # explicit scoped-VMEM cap (safe on v5e/v6e/v7x)


# ----------------------------- kernels ---------------------------------------

def _outer_kernel_small_c(ti_ref, tjl_ref, mu_all_ref, mUT_ref):
    # ti_ref, tjl_ref: (1, TB) f32   -- batch on lanes
    # mu_all_ref:      (C, 1)  f32   -- grid-invariant (DMA'd once)
    # mUT_ref:         (C, TB) f32   -- mU transposed, lane-dense stores
    dts = ti_ref[...] - tjl_ref[...]              # (1, TB)
    mUT_ref[...] = mu_all_ref[...] * dts          # (C, 1) * (1, TB) -> (C, TB)


def _outer_kernel_large_c(ti_ref, tjl_ref, mu_all_ref, mU_ref):
    # ti_ref, tjl_ref: (TB, 1) f32
    # mu_all_ref:      (1, C)  f32   -- grid-invariant (DMA'd once)
    # mU_ref:          (TB, C) f32   -- lane-dense along C (C >= 128)
    dts = ti_ref[...] - tjl_ref[...]              # (TB, 1)
    mU_ref[...] = dts * mu_all_ref[...]           # (TB, 1) * (1, C) -> (TB, C)


# ----------------------------- tile sizing ------------------------------------

def _choose_tb_lanes(B, C):
    """Batch-on-lanes tile width (C < 128 path); multiple of 128."""
    c_pad = _round_up(max(C, 1), 8)
    # double-buffered, (8,128)-padded f32 bytes per batch lane:
    #   ti (1,tb)->(8,tb), tjl (1,tb)->(8,tb), mU^T (C,tb)->(c_pad,tb)
    bytes_per_lane = 2 * 4 * (8 + 8 + c_pad)
    tb_cap = min(16384, max(128, _VMEM_BUDGET // bytes_per_lane // 128 * 128))
    # keep >= 2 grid steps once the batch is big enough (v7x megacore split)
    tb_need = _round_up(max(-(-B // 2), 128), 128)
    return min(tb_cap, tb_need)


def _choose_tb_rows(B, C):
    """Batch-on-sublanes tile height (C >= 128 path); multiple of 8."""
    c_pad = _round_up(C, 128)
    # double-buffered, (8,128)-padded f32 bytes per batch row:
    #   ti (tb,1)->(tb,128), tjl (tb,1)->(tb,128), mU (tb,C)->(tb,c_pad)
    bytes_per_row = 2 * 4 * (128 + 128 + c_pad)
    tb_cap = min(4096, max(8, _VMEM_BUDGET // bytes_per_row // 8 * 8))
    tb_need = _round_up(max(-(-B // 2), 8), 8)
    return min(tb_cap, tb_need)


# ----------------------------- pallas_call wrappers ---------------------------

def _expect_counts_small_c(ti_vec, tjl_vec, mu_all):
    """mU = dts x mu_all^T with batch on lanes (C < 128). Returns (B, C)."""
    B = ti_vec.shape[0]
    C = mu_all.shape[0]

    tb = _choose_tb_lanes(B, C)
    B_pad = _round_up(B, tb)

    ti_row = ti_vec.reshape(1, B)
    tjl_row = tjl_vec.reshape(1, B)
    if B_pad != B:                                      # pad only when needed
        pad = ((0, 0), (0, B_pad - B))
        ti_row = jnp.pad(ti_row, pad)                   # pad rows -> dts = 0, dropped below
        tjl_row = jnp.pad(tjl_row, pad)

    mUT = pl.pallas_call(
        _outer_kernel_small_c,
        out_shape=jax.ShapeDtypeStruct((C, B_pad), jnp.float32),
        grid_spec=pl.GridSpec(
            grid=(B_pad // tb,),
            in_specs=[
                pl.BlockSpec((1, tb), lambda i: (0, i)),   # ti       (batch on lanes)
                pl.BlockSpec((1, tb), lambda i: (0, i)),   # tjs[:, -1]
                pl.BlockSpec((C, 1), lambda i: (0, 0)),    # mu_all   (grid-invariant)
            ],
            out_specs=pl.BlockSpec((C, tb), lambda i: (0, i)),
        ),
        compiler_params=pltpu.CompilerParams(
            dimension_semantics=("parallel",),             # megacore split on v7x
            vmem_limit_bytes=_VMEM_LIMIT,
        ),
    )(ti_row, tjl_row, mu_all)

    # layout plumbing only: lane-dense (C, B) slab back to the module's (B, C)
    return mUT[:, :B].T


def _expect_counts_large_c(ti_vec, tjl_vec, mu_all):
    """mU = dts x mu_all^T in the natural (B, C) orientation (C >= 128)."""
    B = ti_vec.shape[0]
    C = mu_all.shape[0]

    tb = _choose_tb_rows(B, C)
    B_pad = _round_up(B, tb)

    ti_col = ti_vec.reshape(B, 1)
    tjl_col = tjl_vec.reshape(B, 1)
    if B_pad != B:                                      # pad only when needed
        pad = ((0, B_pad - B), (0, 0))
        ti_col = jnp.pad(ti_col, pad)
        tjl_col = jnp.pad(tjl_col, pad)
    mu_all_row = mu_all.reshape(1, C)

    mU = pl.pallas_call(
        _outer_kernel_large_c,
        out_shape=jax.ShapeDtypeStruct((B_pad, C), jnp.float32),
        grid_spec=pl.GridSpec(
            grid=(B_pad // tb,),
            in_specs=[
                pl.BlockSpec((tb, 1), lambda i: (i, 0)),   # ti
                pl.BlockSpec((tb, 1), lambda i: (i, 0)),   # tjs[:, -1]
                pl.BlockSpec((1, C), lambda i: (0, 0)),    # mu_all   (grid-invariant)
            ],
            out_specs=pl.BlockSpec((tb, C), lambda i: (i, 0)),
        ),
        compiler_params=pltpu.CompilerParams(
            dimension_semantics=("parallel",),
            vmem_limit_bytes=_VMEM_LIMIT,
        ),
    )(ti_col, tjl_col, mu_all_row)

    return mU[:B]


def basic_exogenous_intensity_forward(emb_weight, ti, tjs, ci, Cs):
    """JAX/Pallas port of BasicExogenousIntensity.forward.

    emb_weight: (C, 1) float   nn.Embedding weight (dim_embedding == 1)
    ti:         (B, 1) float   event timestamps
    tjs:        (B, M) float   history timestamps
    ci:         (B, 1) int     event types
    Cs:         (C, 1) int     all event types
    returns:    (mu_c (B, 1) float32, mU (B, C) float32)
    """
    B = ti.shape[0]
    emb_w = emb_weight.astype(jnp.float32)

    # Tiny gathers hoisted out of the kernel (perf review): mu_all is
    # grid-invariant and mu_c is an O(B) table lookup — a single XLA gather
    # each, instead of per-tile one-hot compare + reduce work in the kernel.
    mu_c = emb_w[ci.reshape(-1).astype(jnp.int32), :]      # (B, 1)
    mu_all = emb_w[Cs.reshape(-1).astype(jnp.int32), :]    # (C, 1)
    C = mu_all.shape[0]

    ti_f = ti.reshape(B).astype(jnp.float32)
    # Only the last history timestamp is used; the (B,M) window with a
    # lane-sized (.,1) block violates the (8,128) BlockSpec rule, so the
    # column is extracted here (tiny glue op) instead of inside pallas_call.
    tjl_f = tjs[:, -1].astype(jnp.float32)                 # (B,)

    if C < 128:
        mU = _expect_counts_small_c(ti_f, tjl_f, mu_all)
    else:
        mU = _expect_counts_large_c(ti_f, tjl_f, mu_all)
    return mu_c, mU


# ----------------------------- test -------------------------------------------

def _reference(emb_weight, ti, tjs, ci, Cs):
    # pure-JAX reference mirroring the PyTorch forward
    mu_c = emb_weight[ci[:, 0], :]                         # (B, 1)
    dts = ti - tjs[:, -1:]                                 # (B, 1)
    mu_all = emb_weight[Cs[:, 0], :]                       # (C, 1)
    mU = dts @ mu_all.T                                    # (B, C)
    return mu_c, mU


def _run_case(key, B, num_type, memory):
    k_emb, k_ti, k_tjs, k_ci = jax.random.split(key, 4)
    emb_weight = jax.random.uniform(k_emb, (num_type, 1), jnp.float32,
                                    minval=0.01, maxval=1.0)
    tjs = jnp.sort(jax.random.uniform(k_tjs, (B, memory), jnp.float32,
                                      minval=0.0, maxval=5.0), axis=1)
    ti = tjs[:, -1:] + jax.random.uniform(k_ti, (B, 1), jnp.float32,
                                          minval=0.0, maxval=2.0)
    ci = jax.random.randint(k_ci, (B, 1), 0, num_type, dtype=jnp.int32)
    Cs = jnp.arange(num_type, dtype=jnp.int32).reshape(num_type, 1)

    mu_c, mU = basic_exogenous_intensity_forward(emb_weight, ti, tjs, ci, Cs)
    mu_c, mU = jax.block_until_ready((mu_c, mU))

    mu_c_ref, mU_ref = _reference(emb_weight, ti, tjs, ci, Cs)
    np.testing.assert_allclose(np.asarray(mu_c), np.asarray(mu_c_ref),
                               rtol=1e-6, atol=1e-6)
    np.testing.assert_allclose(np.asarray(mU), np.asarray(mU_ref),
                               rtol=1e-6, atol=1e-6)


if __name__ == "__main__":
    key = jax.random.PRNGKey(0)
    k1, k2, k3 = jax.random.split(key, 3)
    _run_case(k1, B=8, num_type=5, memory=4)      # small C: transposed lane-dense path
    _run_case(k2, B=16, num_type=128, memory=4)   # large C: (TB, C) path, 2 grid steps
    _run_case(k3, B=13, num_type=128, memory=4)   # large C with batch padding
    print("KERNEL_OK")
</pallas_src>

<mosaic_0001>
module attributes {stable_mosaic.version = 11 : i64} {
  func.func @_outer_kernel_small_c(%arg0: i32, %arg1: memref<1x128xf32, #tpu.memory_space<vmem>>, %arg2: memref<1x128xf32, #tpu.memory_space<vmem>>, %arg3: memref<5x1xf32, #tpu.memory_space<vmem>>, %arg4: memref<5x128xf32, #tpu.memory_space<vmem>>) attributes {dimension_semantics = [#tpu.dimension_semantics<parallel>], iteration_bounds = array<i64: 1>, scalar_prefetch = 0 : i64, scratch_operands = 0 : i64, tpu.core_type = #tpu.core_type<tc>, window_params = [{transform_indices = @transform_0, window_bounds = array<i64: 1, 128>}, {transform_indices = @transform_1, window_bounds = array<i64: 1, 128>}, {pipeline_mode = #tpu.pipeline_mode<synchronous>, transform_indices = @transform_2, window_bounds = array<i64: 5, 1>}, {transform_indices = @transform_3, window_bounds = array<i64: 5, 128>}]} {
    %c0 = arith.constant 0 : index
    %c0_0 = arith.constant 0 : index
    %0 = vector.load %arg1[%c0, %c0_0] : memref<1x128xf32, #tpu.memory_space<vmem>>, vector<1x128xf32>
    %c0_1 = arith.constant 0 : index
    %c0_2 = arith.constant 0 : index
    %1 = vector.load %arg2[%c0_1, %c0_2] : memref<1x128xf32, #tpu.memory_space<vmem>>, vector<1x128xf32>
    %2 = arith.subf %0, %1 : vector<1x128xf32>
    %c0_3 = arith.constant 0 : index
    %c0_4 = arith.constant 0 : index
    %3 = vector.load %arg3[%c0_3, %c0_4] : memref<5x1xf32, #tpu.memory_space<vmem>>, vector<5x1xf32>
    %4 = vector.broadcast %3 : vector<5x1xf32> to vector<5x128xf32>
    %5 = vector.broadcast %2 : vector<1x128xf32> to vector<5x128xf32>
    %6 = arith.mulf %4, %5 : vector<5x128xf32>
    %c0_5 = arith.constant 0 : index
    %c0_6 = arith.constant 0 : index
    %7 = vector.load %arg4[%c0_5, %c0_6] : memref<5x128xf32, #tpu.memory_space<vmem>>, vector<5x128xf32>
    tpu.vector_store %arg4[%c0_5, %c0_6], %6 {strides = array<i32>} : memref<5x128xf32, #tpu.memory_space<vmem>>, vector<5x128xf32>,
    return
  }
  func.func @transform_0(%arg0: i32) -> (i32, i32) {
    %c0_i32 = arith.constant 0 : i32
    %c0_i32_0 = arith.constant 0 : i32
    return %c0_i32, %arg0 : i32, i32
  }
  func.func @transform_1(%arg0: i32) -> (i32, i32) {
    %c0_i32 = arith.constant 0 : i32
    %c0_i32_0 = arith.constant 0 : i32
    return %c0_i32, %arg0 : i32, i32
  }
  func.func @transform_2(%arg0: i32) -> (i32, i32) {
    %c0_i32 = arith.constant 0 : i32
    %c0_i32_0 = arith.constant 0 : i32
    %c0_i32_1 = arith.constant 0 : i32
    return %c0_i32, %c0_i32_0 : i32, i32
  }
  func.func @transform_3(%arg0: i32) -> (i32, i32) {
    %c0_i32 = arith.constant 0 : i32
    %c0_i32_0 = arith.constant 0 : i32
    return %c0_i32, %arg0 : i32, i32
  }
}

</mosaic_0001>

<bundles_post_ra>
// kernel: tpu_custom_call.1
= control target key start
LH: loop header
LB: loop body
LE: loop exit
PB: predicated region body
PF: predicated region fallthrough
CT: control target
= control target key end

     0   :  { %v73_v1 = vmov 0   ;;  %s116_s0 = inlined_call_operand.vmem [shape: f32[1,128], index: 0, kind: input, shape index: {}]   ;;  %s117_s1 = inlined_call_operand.vmem [shape: f32[1,128], index: 1, kind: input, shape index: {}]   ;;  %s118_s2 = inlined_call_operand.vmem [shape: f32[5,1], index: 2, kind: input, shape index: {}]   ;;  %s119_s3 = inlined_call_operand.hbm [shape: f32[5,128], index: 3, kind: output, shape index: {}]  }
   0x1   :  { %v18_v0 = vld [vmem:[%s118_s2] sm:$0x1f]  ;;  %48 = vset.pattern.permute.xlu0 %v73_v1 }
   0x2   :  { %8 = vsyncpa [#allocation3], 0  ;;  %21 = vperm.xlu0 %48, %v18_v0   ;;  %v25_v2 = vlaneseq  ;;  %v15_v4 = vld [vmem:[%s116_s0] sm:$0x1]  ;;  %s74_s18 = smov [#allocation2]  }
   0x3   :  { %v16_v5 = vld [vmem:[%s117_s1] sm:$0x1]  ;;  %s38_s19 = sshll.u32 %s74_s18, 4  ;;  %s39_s19 = int_to_ptr.vmem [resolvable:$true] %s38_s19 }
   0x4   :  { %v26_v3 = vshrl.u32 %v25_v2, 7  ;;  %v17_v7 = vsub.f32 %v15_v4, %v16_v5  ;;  %s49_s2 = scalar_lea.vmem %s39_s19, 128  ;;  %p54_p1 = scmp.lt.s32.totalorder %s39_s19, %s39_s19 }
   0x5   :  { %p50_p0 = scmp.ne.s32.totalorder %s39_s19, %s49_s2  ;;  %p55_p2 = scmp.lt.s32.totalorder %s49_s2, %s49_s2 }
   0x6   :  { %v27_v6 = vsub.s32 0, %v26_v3 }
   0x7   :  { %p56_p3 = por %p55_p2, %p54_p1 }
   0x8   :  { %v28_v8 = vrot.slane %v17_v7, %v27_v6 }
   0x9   :  { %p57_p4 = pnand %p56_p3, %p50_p0 }
  0x81   :  { %v22_v9 = vpop.permute.xlu0 %21 }
  0x82   :  { %v30_v10 = vmul.f32 %v28_v8, %v22_v9 }
  0x84   :  { %31 = vst [vmem:[#allocation2] sm:$0x1f] %v30_v10 }
  0x85   :  { %60 = shalt.err (!%p57_p4)
}
  0x86   :  { %s61_s1 = scalar_lea.hbm %s119_s3, 128 }
  0x87   :  { %p62_p5 = scmp.ne.s32.totalorder %s119_s3, %s61_s1  ;;  %p65_p6 = scmp.lt.u32.totalorder %s61_s1, %s119_s3 }
  0x89   :  { %p67_p7 = pnand %p65_p6, %p62_p5 }
  0x8b   :  { %70 = shalt.err (!%p67_p7)
}
  0x8c   :  { %41 = dma.vmem_to_hbm [thread:$0]  %s39_s19, 128, %s119_s3, [#allocation3]  }
  0x8d   :  { %71 = dma.done.wait [#allocation3], 128  }
  0x8e   :  { %72 = vsyncadd [#allocation3], 4294967168 }
  0x8f   :  { %45 = vsyncpa [#allocation3], 1 }

</bundles_post_ra>
